<compile_context>
chip_gen: v7x
topology: tpu7x:2x2x1
jax: 0.10.0
libtpu: 0.0.40
codegen_flags: <defaults>
</compile_context>

<pallas_src>
import functools

import jax
import jax.numpy as jnp
from jax.experimental import pallas as pl
from jax.experimental.pallas import tpu as pltpu

LANE = 128
SUBLANE = 8


def _round_up(x, m):
    return ((x + m - 1) // m) * m


# ----------------------------- Pallas kernel ------------------------------ #

def _gcn_fused_kernel(a_ref, x_ref, w1_ref, b1_ref, w2_ref, b2_ref, o_ref,
                      xw1_ref, h_ref, hw2_ref, *, tm):
    """Fused 2-layer GCN.

    Grid = (phase, row_tile).  phase 0: H = relu(A @ (X@W1) + b1) into scratch.
                               phase 1: out = A @ (H@W2) + b2.

    a_ref : (tm, Np)      row tile of normalized adjacency (streamed twice)
    x_ref : (Np, Fp)      node features (resident)
    w1_ref: (Fp, Hp)  b1_ref: (1, Hp)
    w2_ref: (Hp, Op)  b2_ref: (1, Op)
    o_ref : (tm, Op)      output row tile
    xw1_ref: (Np, Hp)  h_ref: (Np, Hp)  hw2_ref: (Np, Op)   (VMEM scratch)
    """
    p = pl.program_id(0)   # phase
    i = pl.program_id(1)   # row tile
    row0 = pl.multiple_of(i * tm, tm)

    # ---- phase 0, first step: X @ W1 computed exactly once ----------------
    @pl.when(jnp.logical_and(p == 0, i == 0))
    def _():
        xw1_ref[...] = jnp.dot(x_ref[...], w1_ref[...],
                               preferred_element_type=jnp.float32)

    # ---- phase 0: build H row tile into scratch ----------------------------
    @pl.when(p == 0)
    def _():
        h_tile = jnp.dot(a_ref[...], xw1_ref[...],
                         preferred_element_type=jnp.float32) + b1_ref[...]
        h_ref[pl.ds(row0, tm), :] = jnp.maximum(h_tile, 0.0)
        # Output block is revisited in phase 1; write zeros now so the interim
        # HBM writeback is deterministic (fully overwritten in phase 1).
        o_ref[...] = jnp.zeros_like(o_ref)

    # ---- phase 1, first step: H @ W2 computed exactly once -----------------
    @pl.when(jnp.logical_and(p == 1, i == 0))
    def _():
        hw2_ref[...] = jnp.dot(h_ref[...], w2_ref[...],
                               preferred_element_type=jnp.float32)

    # ---- phase 1: output row tile (bias in the epilogue only) --------------
    @pl.when(p == 1)
    def _():
        out_tile = jnp.dot(a_ref[...], hw2_ref[...],
                           preferred_element_type=jnp.float32) + b2_ref[...]
        o_ref[...] = out_tile.astype(o_ref.dtype)


# ------------------------------ wrapper ------------------------------------ #

def gcn_forward_pallas(params, x, a_norm):
    """Run the fused 2-layer GCN in a single pallas_call (lane-padded)."""
    n, f_in = x.shape
    hidden = params["w1"].shape[1]
    out_dim = params["w2"].shape[1]

    # Lane-dense padding of feature dims; row tiling of the node dim.
    f_pad = _round_up(f_in, LANE)
    h_pad = _round_up(hidden, LANE)
    o_pad = _round_up(out_dim, LANE)
    if n >= 512:
        tm = 256
    elif n >= 128:
        tm = 128
    else:
        tm = SUBLANE
    n_pad = _round_up(n, tm)
    n_tiles = n_pad // tm

    f32 = jnp.float32
    a_p = jnp.zeros((n_pad, n_pad), f32).at[:n, :n].set(a_norm.astype(f32))
    x_p = jnp.zeros((n_pad, f_pad), f32).at[:n, :f_in].set(x.astype(f32))
    w1_p = jnp.zeros((f_pad, h_pad), f32).at[:f_in, :hidden].set(params["w1"])
    b1_p = jnp.zeros((1, h_pad), f32).at[0, :hidden].set(params["b1"])
    w2_p = jnp.zeros((h_pad, o_pad), f32).at[:hidden, :out_dim].set(params["w2"])
    b2_p = jnp.zeros((1, o_pad), f32).at[0, :out_dim].set(params["b2"])

    flops = (2 * n_pad * f_pad * h_pad          # X @ W1
             + 2 * n_pad * n_pad * h_pad        # A @ XW1
             + 2 * n_pad * h_pad * o_pad        # H @ W2
             + 2 * n_pad * n_pad * o_pad)       # A @ HW2
    bytes_accessed = 4 * (2 * n_pad * n_pad            # A streamed twice
                          + n_pad * f_pad              # X
                          + f_pad * h_pad + h_pad * o_pad + h_pad + o_pad
                          + 2 * n_pad * o_pad)         # output (2 writebacks)

    out_padded = pl.pallas_call(
        functools.partial(_gcn_fused_kernel, tm=tm),
        out_shape=jax.ShapeDtypeStruct((n_pad, o_pad), f32),
        grid_spec=pltpu.PrefetchScalarGridSpec(
            num_scalar_prefetch=0,
            grid=(2, n_tiles),                                   # (phase, row tile)
            in_specs=[
                pl.BlockSpec((tm, n_pad), lambda p, i: (i, 0)),  # A row tile
                pl.BlockSpec((n_pad, f_pad), lambda p, i: (0, 0)),  # X (resident)
                pl.BlockSpec((f_pad, h_pad), lambda p, i: (0, 0)),  # W1
                pl.BlockSpec((1, h_pad), lambda p, i: (0, 0)),      # b1
                pl.BlockSpec((h_pad, o_pad), lambda p, i: (0, 0)),  # W2
                pl.BlockSpec((1, o_pad), lambda p, i: (0, 0)),      # b2
            ],
            out_specs=pl.BlockSpec((tm, o_pad), lambda p, i: (i, 0)),
            scratch_shapes=[
                pltpu.VMEM((n_pad, h_pad), f32),   # X @ W1
                pltpu.VMEM((n_pad, h_pad), f32),   # H = relu(A @ XW1 + b1)
                pltpu.VMEM((n_pad, o_pad), f32),   # H @ W2
            ],
        ),
        compiler_params=pltpu.CompilerParams(
            # Row axis can't be megacore-parallel: H scratch is shared across
            # row tiles between phases.
            dimension_semantics=("arbitrary", "arbitrary"),
            vmem_limit_bytes=48 * 1024 * 1024,   # headroom; stays < 64 MiB (v7x)
        ),
        cost_estimate=pl.CostEstimate(flops=flops, transcendentals=0,
                                      bytes_accessed=bytes_accessed),
    )(a_p, x_p, w1_p, b1_p, w2_p, b2_p)

    return out_padded[:n, :out_dim]


# ------------------------------ JAX glue ----------------------------------- #

def build_normalized_adjacency(edge_index, num_nodes):
    """Dense D^{-1/2}(A+I)D^{-1/2} from edge_index (2, E) = [source; target]."""
    src = edge_index[0]
    dst = edge_index[1]
    adj = jnp.zeros((num_nodes, num_nodes), dtype=jnp.float32)
    # message flows source -> target:  A[target, source] += 1
    adj = adj.at[dst, src].add(1.0)
    adj = adj + jnp.eye(num_nodes, dtype=jnp.float32)      # self loops
    deg = adj.sum(axis=1)
    d_inv_sqrt = jnp.where(deg > 0, jax.lax.rsqrt(deg), 0.0)
    return d_inv_sqrt[:, None] * adj * d_inv_sqrt[None, :]


def init_gcn_params(key, in_dim, hidden, out_dim):
    """Glorot-uniform weights, zero biases (matches GCNConv init shapes)."""
    k1, k2 = jax.random.split(key)

    def glorot(k, fan_in, fan_out):
        limit = (6.0 / (fan_in + fan_out)) ** 0.5
        return jax.random.uniform(k, (fan_in, fan_out), jnp.float32, -limit, limit)

    return {
        "w1": glorot(k1, in_dim, hidden),
        "b1": jnp.zeros((hidden,), jnp.float32),
        "w2": glorot(k2, hidden, out_dim),
        "b2": jnp.zeros((out_dim,), jnp.float32),
    }


@jax.jit
def gcn_forward(params, x, a_norm):
    return gcn_forward_pallas(params, x, a_norm)


def gcn_forward_ref(params, x, a_norm):
    """Pure-JAX reference for correctness check."""
    h = jnp.maximum(a_norm @ (x @ params["w1"]) + params["b1"], 0.0)
    return a_norm @ (h @ params["w2"]) + params["b2"]


# --------------------------------- main ------------------------------------ #

if __name__ == "__main__":
    N, IN_DIM, HIDDEN, OUT_DIM, E = 16, 8, 32, 4, 40

    key = jax.random.PRNGKey(0)
    k_x, k_e, k_p = jax.random.split(key, 3)

    x = jax.random.normal(k_x, (N, IN_DIM), jnp.float32)
    # random directed edges; duplicates allowed (scatter-add, like PyG)
    edge_index = jax.random.randint(k_e, (2, E), 0, N, dtype=jnp.int32)

    params = init_gcn_params(k_p, IN_DIM, HIDDEN, OUT_DIM)
    a_norm = build_normalized_adjacency(edge_index, N)

    out = gcn_forward(params, x, a_norm)
    out = jax.block_until_ready(out)

    ref = gcn_forward_ref(params, x, a_norm)
    assert out.shape == (N, OUT_DIM)
    assert jnp.allclose(out, ref, atol=1e-4, rtol=1e-4), "mismatch vs reference"

    print("KERNEL_OK")
</pallas_src>

<mosaic_0001>
module attributes {stable_mosaic.version = 11 : i64} {
  func.func @_gcn_fused_kernel(%arg0: i32, %arg1: i32, %arg2: memref<8x16xf32, #tpu.memory_space<vmem>>, %arg3: memref<16x128xf32, #tpu.memory_space<vmem>>, %arg4: memref<128x128xf32, #tpu.memory_space<vmem>>, %arg5: memref<1x128xf32, #tpu.memory_space<vmem>>, %arg6: memref<128x128xf32, #tpu.memory_space<vmem>>, %arg7: memref<1x128xf32, #tpu.memory_space<vmem>>, %arg8: memref<8x128xf32, #tpu.memory_space<vmem>>, %arg9: memref<16x128xf32, #tpu.memory_space<vmem>>, %arg10: memref<16x128xf32, #tpu.memory_space<vmem>>, %arg11: memref<16x128xf32, #tpu.memory_space<vmem>>) attributes {dimension_semantics = [#tpu.dimension_semantics<arbitrary>, #tpu.dimension_semantics<arbitrary>], iteration_bounds = array<i64: 2, 2>, scalar_prefetch = 0 : i64, scratch_operands = 3 : i64, tpu.core_type = #tpu.core_type<tc>, window_params = [{transform_indices = @transform_0, window_bounds = array<i64: 8, 16>}, {pipeline_mode = #tpu.pipeline_mode<synchronous>, transform_indices = @transform_1, window_bounds = array<i64: 16, 128>}, {pipeline_mode = #tpu.pipeline_mode<synchronous>, transform_indices = @transform_2, window_bounds = array<i64: 128, 128>}, {pipeline_mode = #tpu.pipeline_mode<synchronous>, transform_indices = @transform_3, window_bounds = array<i64: 1, 128>}, {pipeline_mode = #tpu.pipeline_mode<synchronous>, transform_indices = @transform_4, window_bounds = array<i64: 128, 128>}, {pipeline_mode = #tpu.pipeline_mode<synchronous>, transform_indices = @transform_5, window_bounds = array<i64: 1, 128>}, {transform_indices = @transform_6, window_bounds = array<i64: 8, 128>}]} {
    %c8_i32 = arith.constant 8 : i32
    %0 = arith.muli %arg1, %c8_i32 : i32
    %1 = tpu.assume_multiple %0, 8 : i32
    %c0_i32 = arith.constant 0 : i32
    %2 = arith.cmpi eq, %arg0, %c0_i32 : i32
    %c0_i32_0 = arith.constant 0 : i32
    %3 = arith.cmpi eq, %arg1, %c0_i32_0 : i32
    %4 = arith.andi %2, %3 : i1
    %5 = arith.extui %4 : i1 to i32
    %c0_i32_1 = arith.constant 0 : i32
    %6 = arith.cmpi ne, %5, %c0_i32_1 : i32
    scf.if %6 {
      %c0 = arith.constant 0 : index
      %c0_8 = arith.constant 0 : index
      %18 = vector.load %arg3[%c0, %c0_8] : memref<16x128xf32, #tpu.memory_space<vmem>>, vector<16x128xf32>
      %c0_9 = arith.constant 0 : index
      %c0_10 = arith.constant 0 : index
      %19 = vector.load %arg4[%c0_9, %c0_10] : memref<128x128xf32, #tpu.memory_space<vmem>>, vector<128x128xf32>
      %cst = arith.constant dense<0.000000e+00> : vector<16x128xf32>
      %20 = tpu.matmul %18, %19, %cst {dimension_numbers = #tpu.dot_dimension_numbers<[1], [0], [0], [1], [0, 0, 1, 1], [], []>} : vector<16x128xf32>, vector<128x128xf32>, vector<16x128xf32> -> vector<16x128xf32>
      %c0_11 = arith.constant 0 : index
      %c0_12 = arith.constant 0 : index
      %21 = vector.load %arg9[%c0_11, %c0_12] : memref<16x128xf32, #tpu.memory_space<vmem>>, vector<16x128xf32>
      tpu.vector_store %arg9[%c0_11, %c0_12], %20 {strides = array<i32>} : memref<16x128xf32, #tpu.memory_space<vmem>>, vector<16x128xf32>,
    } else {
    }
    %c0_i32_2 = arith.constant 0 : i32
    %7 = arith.cmpi eq, %arg0, %c0_i32_2 : i32
    %8 = arith.extui %7 : i1 to i32
    %c0_i32_3 = arith.constant 0 : i32
    %9 = arith.cmpi ne, %8, %c0_i32_3 : i32
    scf.if %9 {
      %c0 = arith.constant 0 : index
      %c0_8 = arith.constant 0 : index
      %18 = vector.load %arg2[%c0, %c0_8] : memref<8x16xf32, #tpu.memory_space<vmem>>, vector<8x16xf32>
      %c0_9 = arith.constant 0 : index
      %c0_10 = arith.constant 0 : index
      %19 = vector.load %arg9[%c0_9, %c0_10] : memref<16x128xf32, #tpu.memory_space<vmem>>, vector<16x128xf32>
      %cst = arith.constant dense<0.000000e+00> : vector<8x128xf32>
      %20 = tpu.matmul %18, %19, %cst {dimension_numbers = #tpu.dot_dimension_numbers<[1], [0], [0], [1], [0, 0, 1, 1], [], []>} : vector<8x16xf32>, vector<16x128xf32>, vector<8x128xf32> -> vector<8x128xf32>
      %c0_11 = arith.constant 0 : index
      %c0_12 = arith.constant 0 : index
      %21 = vector.load %arg5[%c0_11, %c0_12] : memref<1x128xf32, #tpu.memory_space<vmem>>, vector<1x128xf32>
      %22 = vector.broadcast %21 : vector<1x128xf32> to vector<8x128xf32>
      %23 = arith.addf %20, %22 : vector<8x128xf32>
      %cst_13 = arith.constant 0.000000e+00 : f32
      %24 = vector.broadcast %cst_13 : f32 to vector<8x128xf32>
      %25 = arith.maximumf %23, %24 : vector<8x128xf32>
      %26 = arith.index_cast %1 : i32 to index
      %c0_14 = arith.constant 0 : index
      %27 = vector.load %arg10[%26, %c0_14] : memref<16x128xf32, #tpu.memory_space<vmem>>, vector<8x128xf32>
      tpu.vector_store %arg10[%26, %c0_14], %25 {strides = array<i32>} : memref<16x128xf32, #tpu.memory_space<vmem>>, vector<8x128xf32>,
      %cst_15 = arith.constant 0.000000e+00 : f32
      %28 = vector.broadcast %cst_15 : f32 to vector<8x128xf32>
      %c0_16 = arith.constant 0 : index
      %c0_17 = arith.constant 0 : index
      %29 = vector.load %arg8[%c0_16, %c0_17] : memref<8x128xf32, #tpu.memory_space<vmem>>, vector<8x128xf32>
      tpu.vector_store %arg8[%c0_16, %c0_17], %28 {strides = array<i32>} : memref<8x128xf32, #tpu.memory_space<vmem>>, vector<8x128xf32>,
    } else {
    }
    %c1_i32 = arith.constant 1 : i32
    %10 = arith.cmpi eq, %arg0, %c1_i32 : i32
    %c0_i32_4 = arith.constant 0 : i32
    %11 = arith.cmpi eq, %arg1, %c0_i32_4 : i32
    %12 = arith.andi %10, %11 : i1
    %13 = arith.extui %12 : i1 to i32
    %c0_i32_5 = arith.constant 0 : i32
    %14 = arith.cmpi ne, %13, %c0_i32_5 : i32
    scf.if %14 {
      %c0 = arith.constant 0 : index
      %c0_8 = arith.constant 0 : index
      %18 = vector.load %arg10[%c0, %c0_8] : memref<16x128xf32, #tpu.memory_space<vmem>>, vector<16x128xf32>
      %c0_9 = arith.constant 0 : index
      %c0_10 = arith.constant 0 : index
      %19 = vector.load %arg6[%c0_9, %c0_10] : memref<128x128xf32, #tpu.memory_space<vmem>>, vector<128x128xf32>
      %cst = arith.constant dense<0.000000e+00> : vector<16x128xf32>
      %20 = tpu.matmul %18, %19, %cst {dimension_numbers = #tpu.dot_dimension_numbers<[1], [0], [0], [1], [0, 0, 1, 1], [], []>} : vector<16x128xf32>, vector<128x128xf32>, vector<16x128xf32> -> vector<16x128xf32>
      %c0_11 = arith.constant 0 : index
      %c0_12 = arith.constant 0 : index
      %21 = vector.load %arg11[%c0_11, %c0_12] : memref<16x128xf32, #tpu.memory_space<vmem>>, vector<16x128xf32>
      tpu.vector_store %arg11[%c0_11, %c0_12], %20 {strides = array<i32>} : memref<16x128xf32, #tpu.memory_space<vmem>>, vector<16x128xf32>,
    } else {
    }
    %c1_i32_6 = arith.constant 1 : i32
    %15 = arith.cmpi eq, %arg0, %c1_i32_6 : i32
    %16 = arith.extui %15 : i1 to i32
    %c0_i32_7 = arith.constant 0 : i32
    %17 = arith.cmpi ne, %16, %c0_i32_7 : i32
    scf.if %17 {
      %c0 = arith.constant 0 : index
      %c0_8 = arith.constant 0 : index
      %18 = vector.load %arg2[%c0, %c0_8] : memref<8x16xf32, #tpu.memory_space<vmem>>, vector<8x16xf32>
      %c0_9 = arith.constant 0 : index
      %c0_10 = arith.constant 0 : index
      %19 = vector.load %arg11[%c0_9, %c0_10] : memref<16x128xf32, #tpu.memory_space<vmem>>, vector<16x128xf32>
      %cst = arith.constant dense<0.000000e+00> : vector<8x128xf32>
      %20 = tpu.matmul %18, %19, %cst {dimension_numbers = #tpu.dot_dimension_numbers<[1], [0], [0], [1], [0, 0, 1, 1], [], []>} : vector<8x16xf32>, vector<16x128xf32>, vector<8x128xf32> -> vector<8x128xf32>
      %c0_11 = arith.constant 0 : index
      %c0_12 = arith.constant 0 : index
      %21 = vector.load %arg7[%c0_11, %c0_12] : memref<1x128xf32, #tpu.memory_space<vmem>>, vector<1x128xf32>
      %22 = vector.broadcast %21 : vector<1x128xf32> to vector<8x128xf32>
      %23 = arith.addf %20, %22 : vector<8x128xf32>
      %c0_13 = arith.constant 0 : index
      %c0_14 = arith.constant 0 : index
      %24 = vector.load %arg8[%c0_13, %c0_14] : memref<8x128xf32, #tpu.memory_space<vmem>>, vector<8x128xf32>
      tpu.vector_store %arg8[%c0_13, %c0_14], %23 {strides = array<i32>} : memref<8x128xf32, #tpu.memory_space<vmem>>, vector<8x128xf32>,
    } else {
    }
    return
  }
  func.func @transform_0(%arg0: i32, %arg1: i32) -> (i32, i32) {
    %c0_i32 = arith.constant 0 : i32
    %c0_i32_0 = arith.constant 0 : i32
    return %arg1, %c0_i32 : i32, i32
  }
  func.func @transform_1(%arg0: i32, %arg1: i32) -> (i32, i32) {
    %c0_i32 = arith.constant 0 : i32
    %c0_i32_0 = arith.constant 0 : i32
    %c0_i32_1 = arith.constant 0 : i32
    return %c0_i32, %c0_i32_0 : i32, i32
  }
  func.func @transform_2(%arg0: i32, %arg1: i32) -> (i32, i32) {
    %c0_i32 = arith.constant 0 : i32
    %c0_i32_0 = arith.constant 0 : i32
    %c0_i32_1 = arith.constant 0 : i32
    return %c0_i32, %c0_i32_0 : i32, i32
  }
  func.func @transform_3(%arg0: i32, %arg1: i32) -> (i32, i32) {
    %c0_i32 = arith.constant 0 : i32
    %c0_i32_0 = arith.constant 0 : i32
    %c0_i32_1 = arith.constant 0 : i32
    return %c0_i32, %c0_i32_0 : i32, i32
  }
  func.func @transform_4(%arg0: i32, %arg1: i32) -> (i32, i32) {
    %c0_i32 = arith.constant 0 : i32
    %c0_i32_0 = arith.constant 0 : i32
    %c0_i32_1 = arith.constant 0 : i32
    return %c0_i32, %c0_i32_0 : i32, i32
  }
  func.func @transform_5(%arg0: i32, %arg1: i32) -> (i32, i32) {
    %c0_i32 = arith.constant 0 : i32
    %c0_i32_0 = arith.constant 0 : i32
    %c0_i32_1 = arith.constant 0 : i32
    return %c0_i32, %c0_i32_0 : i32, i32
  }
  func.func @transform_6(%arg0: i32, %arg1: i32) -> (i32, i32) {
    %c0_i32 = arith.constant 0 : i32
    %c0_i32_0 = arith.constant 0 : i32
    return %arg1, %c0_i32 : i32, i32
  }
}

</mosaic_0001>

<bundles_post_ra>
// kernel: gcn_forward.1
= control target key start
LH: loop header
LB: loop body
LE: loop exit
PB: predicated region body
PF: predicated region fallthrough
CT: control target
= control target key end

     0   :  { %s1045_s21 = smov 0   ;;  %s1047_s22 = smov 0   ;;  %s1230_s0 = inlined_call_operand.vmem [shape: f32[16,16], index: 0, kind: input, shape index: {}]   ;;  %s1231_s1 = inlined_call_operand.vmem [shape: f32[16,128], index: 1, kind: input, shape index: {}]   ;;  %s1232_s2 = inlined_call_operand.vmem [shape: f32[128,128], index: 2, kind: input, shape index: {}]   ;;  %s1233_s3 = inlined_call_operand.vmem [shape: f32[1,128], index: 3, kind: input, shape index: {}]   ;;  %s1234_s4 = inlined_call_operand.vmem [shape: f32[128,128], index: 4, kind: input, shape index: {}]   ;;  %s1235_s5 = inlined_call_operand.vmem [shape: f32[1,128], index: 5, kind: input, shape index: {}]   ;;  %s1236_s6 = inlined_call_operand.vmem [shape: f32[16,128], index: 6, kind: output, shape index: {}]  }
   0x1   :  { %s1049_s23 = smov 0   ;;  %s1051_s24 = smov 0  }
   0x2   :  { %s1053_s25 = smov 0  }
   0x3 LB: > { %s25_s26 = sadd.s32 1, %s994_s23  ;;  %s28_s27 = sadd.s32 1, %s998_s24  ;;  %s1002_s25 = sphi %s1053_s25, %s16_s25   ;;  %s998_s24 = sphi %s1051_s24, %s1240_s24   ;;  %s994_s23 = sphi %s1049_s23, %s1239_s23   ;;  %s990_s22 = sphi %s1047_s22, %s1238_s22   ;;  %s986_s21 = sphi %s1045_s21, %s1237_s21  }
   0x4   : > { %p26_p0 = scmp.ge.s32.totalorder %s25_s26, 2  ;;  %p710_p1 = scmp.ge.s32.totalorder %s1002_s25, 1 }
   0x5   : > { %p223_p2 = scmp.lt.s32.totalorder %s1002_s25, 5 }
   0x6   : > { %s1242_s26 = smov (%p26_p0, %s25_s26), 0  ;;  %s1244_s27 = smov (!%p26_p0, %s28_s27), %s998_s24 }
   0x7   : > { %p224_p3 = pnand %p710_p1, %p223_p2  ;;  %p30_p4 = scmp.ge.s32.totalorder %s1244_s27, 2 }
   0x8   : > { %p251_p5 = scmp.lt.s32.totalorder (!%p224_p3), %s986_s21, 1  ;;  %s713_s28 = sshll.u32 (!%p224_p3), %s986_s21, 3 }
   0x9   : > { %s1246_s27 = smov (%p30_p4, %s1244_s27), 0  ;;  %227 = sbr.rel (%p224_p3) target bundleno = 974 (0x3ce), region = 44 }
   0xa   : > { %p260_p6 = scmp.eq.s32.totalorder (!%p224_p3), %s990_s22, 0  ;;  %p261_p7 = scmp.eq.s32.totalorder (!%p224_p3), %s986_s21, 0 }
   0xc   : > { %p262_p8 = pnand (!%p224_p3), %p261_p7, %p260_p6 }
  0x10   : > { %s252_s29 = scalar_select %p251_p5, %s986_s21, 1 }
  0x11   : > { %265 = sbr.rel (%p262_p8) target bundleno = 266 (0x10a), region = 48  ;;  %v268_v0 = vld [vmem:[%s1232_s2] sm:$0xff] (!%p262_p8)  ;;  %v269_v1 = vld [vmem:[%s1232_s2 + $0x8] sm:$0xff] (!%p262_p8)  ;;  %v270_v2 = vld [vmem:[%s1232_s2 + $0x10] sm:$0xff] (!%p262_p8) }
  0x12   : > { %s711_s30 = sshll.u32 %s252_s29, 3  ;;  %v848_v3 = vpack.c.bf16 (!%p262_p8), %v269_v1, %v268_v0  ;;  %v271_v4 = vld [vmem:[%s1232_s2 + $0x18] sm:$0xff] (!%p262_p8)  ;;  %v272_v6 = vld [vmem:[%s1232_s2 + $0x20] sm:$0xff] (!%p262_p8)  ;;  %v273_v7 = vld [vmem:[%s1232_s2 + $0x28] sm:$0xff] (!%p262_p8) }
  0x13   : > { %s1089_s9 = scalar_lea.vmem %s1230_s0, %s711_s30  ;;  %s1094_s12 = scalar_lea.vmem %s1236_s6, %s711_s30  ;;  %v852_v5 = vpack.c.bf16 (!%p262_p8), %v271_v4, %v270_v2  ;;  %v856_v8 = vpack.c.bf16 (!%p262_p8), %v273_v7, %v272_v6  ;;  %v266_v9 = vld [vmem:[%s1231_s1] sm:$0xff] (!%p262_p8)  ;;  %v274_v10 = vld [vmem:[%s1232_s2 + $0x30] sm:$0xff] (!%p262_p8)  ;;  %v275_v11 = vld [vmem:[%s1232_s2 + $0x38] sm:$0xff] (!%p262_p8) }
  0x14   : > { %849 = vmatprep.subr.bf16.mxu0 (!%p262_p8), %v848_v3  ;;  %796 = vmatprep.mubr.f32.mxu0 (!%p262_p8), %v266_v9  ;;  %v860_v12 = vpack.c.bf16 (!%p262_p8), %v275_v11, %v274_v10  ;;  %v276_v13 = vld [vmem:[%s1232_s2 + $0x40] sm:$0xff] (!%p262_p8)  ;;  %v277_v14 = vld [vmem:[%s1232_s2 + $0x48] sm:$0xff] (!%p262_p8)  ;;  %v278_v16 = vld [vmem:[%s1232_s2 + $0x50] sm:$0xff] (!%p262_p8) }
  0x15   : > { %851 = vmatpush3.bf16.msra.mxu0 (!%p262_p8), %v848_v3  ;;  %v864_v15 = vpack.c.bf16 (!%p262_p8), %v277_v14, %v276_v13  ;;  %v279_v17 = vld [vmem:[%s1232_s2 + $0x58] sm:$0xff] (!%p262_p8)  ;;  %v280_v19 = vld [vmem:[%s1232_s2 + $0x60] sm:$0xff] (!%p262_p8)  ;;  %v281_v20 = vld [vmem:[%s1232_s2 + $0x68] sm:$0xff] (!%p262_p8) }
  0x16   : > { %853 = vmatprep.subr.bf16.mxu0 (!%p262_p8), %v852_v5  ;;  %v868_v18 = vpack.c.bf16 (!%p262_p8), %v279_v17, %v278_v16  ;;  %v872_v21 = vpack.c.bf16 (!%p262_p8), %v281_v20, %v280_v19  ;;  %v282_v22 = vld [vmem:[%s1232_s2 + $0x70] sm:$0xff] (!%p262_p8)  ;;  %v283_v23 = vld [vmem:[%s1232_s2 + $0x78] sm:$0xff] (!%p262_p8)  ;;  %v267_v25 = vld [vmem:[%s1231_s1 + $0x8] sm:$0xff] (!%p262_p8) }
  0x17   : > { %v876_v24 = vpack.c.bf16 (!%p262_p8), %v283_v23, %v282_v22 }
  0x19   : > { %855 = vmatpush3.bf16.msra.mxu0 %v852_v5 }
  0x1a   : > { %857 = vmatprep.subr.bf16.mxu0 %v856_v8 }
  0x1d   : > { %859 = vmatpush3.bf16.msra.mxu0 %v856_v8 }
  0x1e   : > { %861 = vmatprep.subr.bf16.mxu0 %v860_v12 }
  0x21   : > { %863 = vmatpush3.bf16.msra.mxu0 %v860_v12 }
  0x22   : > { %865 = vmatprep.subr.bf16.mxu0 %v864_v15 }
  0x25   : > { %867 = vmatpush3.bf16.msra.mxu0 %v864_v15 }
  0x26   : > { %869 = vmatprep.subr.bf16.mxu0 %v868_v18 }
  0x29   : > { %871 = vmatpush3.bf16.msra.mxu0 %v868_v18 }
  0x2a   : > { %873 = vmatprep.subr.bf16.mxu0 %v872_v21 }
  0x2d   : > { %875 = vmatpush3.bf16.msra.mxu0 %v872_v21 }
  0x2e   : > { %877 = vmatprep.subr.bf16.mxu0 %v876_v24 }
  0x31   : > { %879 = vmatpush3.bf16.msra.mxu0 %v876_v24 }
  0x34   : > { %797 = vmatmul.mubr.f32.vlgmr.msra.gmra.mrb[0].mxu0 %v267_v25 }
 0x107   : > { %v798_v26 = vpop.f32.mrb[0].mxu0 }
 0x108   : > { %360 = vst [vmem:[#allocation2 + $0x8] sm:$0xff] %v798_v26  ;;  %v350_v27 = vpop.f32.mrb[1].mxu0 }
 0x109   : > { %359 = vst [vmem:[#allocation2] sm:$0xff] %v350_v27 }
 0x10a PF: > { %p714_p9 = scmp.ne.s32.totalorder %s990_s22, 0 }
 0x10b   : > { %v1004_v30 = vmov (!%p714_p9), 0.0|0.0   ;;  %vm1005_vm0 = vmmov (!%p714_p9), 0   ;;  %v1006_v32 = vmov (!%p714_p9), 0.0   ;;  %v364_v33 = vld [vmem:[%s1089_s9] sm:$0xff] (!%p714_p9)  ;;  %vm374_vm1 = vcmask (!%p714_p9), 130048   ;;  %s449_s7 = scalar_lea.vmem (!%p714_p9), [#allocation3], %s713_s28 }
 0x10c   : > { %363 = sbr.rel (%p714_p9) target bundleno = 495 (0x1ef), region = 52  ;;  %880 = vmatprep.subr.bf16.mxu0 (!%p714_p9), %v1004_v30  ;;  %803 = vmatprep.mubr.msk.f32.mxu0 (!%p714_p9), %vm1005_vm0, %v1006_v32  ;;  %451 = vst [vmem:[%s1094_s12] sm:$0xff] (!%p714_p9), %v1006_v32  ;;  %v715_v34 = vld [vmem:[%s1233_s3] ss:$0 sm:$0xff] (!%p714_p9) }
 0x10f   : > { %v366_v29 = vld [vmem:[#allocation2 + $0x8] sm:$0xff] (!%p714_p9) }
 0x110   : > { %v365_v28 = vld [vmem:[#allocation2] sm:$0xff] (!%p714_p9) }
 0x111   : > { %v881_v31 = vpack.c.bf16 (!%p714_p9), %v366_v29, %v365_v28 }
 0x113   : > { %882 = vmatpush3.bf16.msra.mxu0 %v881_v31 }
 0x116   : > { %804 = vmatmul.mubr.msk.f32.vlgmr.msra.gmra.mrb[0].mxu0 %vm374_vm1, %v364_v33 }
 0x1e9   : > { %v444_v35 = vpop.f32.mrb[0].mxu0 }
 0x1ea   : > { %v445_v36 = vadd.f32 %v715_v34, %v444_v35  ;;  %v805_v37 = vpop.f32.mrb[1].mxu0 }
 0x1ec   : > { %v448_v38 = vmax.f32 %v445_v36, 0.0 }
 0x1ee   : > { %450 = vst [vmem:[%s449_s7] sm:$0xff] %v448_v38 }
 0x1ef PF: > { %p452_p10 = scmp.eq.s32.totalorder %s990_s22, 1 }
 0x1f1   : > { %p453_p11 = pnand %p452_p10, %p261_p7 }
 0x1f2   : > { %v459_v39 = vld [vmem:[%s1234_s4] sm:$0xff] (!%p453_p11)  ;;  %v460_v40 = vld [vmem:[%s1234_s4 + $0x8] sm:$0xff] (!%p453_p11)  ;;  %v461_v41 = vld [vmem:[%s1234_s4 + $0x10] sm:$0xff] (!%p453_p11) }
 0x1f3   : > { %456 = sbr.rel (%p453_p11) target bundleno = 747 (0x2eb), region = 56  ;;  %v883_v42 = vpack.c.bf16 (!%p453_p11), %v460_v40, %v459_v39  ;;  %v462_v43 = vld [vmem:[%s1234_s4 + $0x18] sm:$0xff] (!%p453_p11)  ;;  %v463_v45 = vld [vmem:[%s1234_s4 + $0x20] sm:$0xff] (!%p453_p11)  ;;  %v464_v46 = vld [vmem:[%s1234_s4 + $0x28] sm:$0xff] (!%p453_p11) }
 0x1f4   : > { %v887_v44 = vpack.c.bf16 (!%p453_p11), %v462_v43, %v461_v41  ;;  %v891_v47 = vpack.c.bf16 (!%p453_p11), %v464_v46, %v463_v45  ;;  %v465_v49 = vld [vmem:[%s1234_s4 + $0x30] sm:$0xff] (!%p453_p11)  ;;  %v466_v50 = vld [vmem:[%s1234_s4 + $0x38] sm:$0xff] (!%p453_p11)  ;;  %v467_v52 = vld [vmem:[%s1234_s4 + $0x40] sm:$0xff] (!%p453_p11) }
 0x1f5   : > { %884 = vmatprep.subr.bf16.mxu0 (!%p453_p11), %v883_v42  ;;  %v457_v48 = vld [vmem:[#allocation3] sm:$0xff] (!%p453_p11)  ;;  %v895_v51 = vpack.c.bf16 (!%p453_p11), %v466_v50, %v465_v49  ;;  %v468_v53 = vld [vmem:[%s1234_s4 + $0x48] sm:$0xff] (!%p453_p11)  ;;  %v470_v56 = vld [vmem:[%s1234_s4 + $0x58] sm:$0xff] (!%p453_p11) }
 0x1f6   : > { %886 = vmatpush3.bf16.msra.mxu0 (!%p453_p11), %v883_v42  ;;  %838 = vmatprep.mubr.f32.mxu0 (!%p453_p11), %v457_v48  ;;  %v899_v54 = vpack.c.bf16 (!%p453_p11), %v468_v53, %v467_v52  ;;  %v469_v55 = vld [vmem:[%s1234_s4 + $0x50] sm:$0xff] (!%p453_p11)  ;;  %v471_v58 = vld [vmem:[%s1234_s4 + $0x60] sm:$0xff] (!%p453_p11)  ;;  %v472_v59 = vld [vmem:[%s1234_s4 + $0x68] sm:$0xff] (!%p453_p11) }
 0x1f7   : > { %888 = vmatprep.subr.bf16.mxu0 (!%p453_p11), %v887_v44  ;;  %v903_v57 = vpack.c.bf16 (!%p453_p11), %v470_v56, %v469_v55  ;;  %v907_v60 = vpack.c.bf16 (!%p453_p11), %v472_v59, %v471_v58  ;;  %v473_v61 = vld [vmem:[%s1234_s4 + $0x70] sm:$0xff] (!%p453_p11)  ;;  %v474_v62 = vld [vmem:[%s1234_s4 + $0x78] sm:$0xff] (!%p453_p11) }
 0x1f8   : > { %v911_v63 = vpack.c.bf16 (!%p453_p11), %v474_v62, %v473_v61  ;;  %v458_v0 = vld [vmem:[#allocation3 + $0x8] sm:$0xff] (!%p453_p11) }
 0x1fa   : > { %890 = vmatpush3.bf16.msra.mxu0 %v887_v44 }
 0x1fb   : > { %892 = vmatprep.subr.bf16.mxu0 %v891_v47 }
 0x1fe   : > { %894 = vmatpush3.bf16.msra.mxu0 %v891_v47 }
 0x1ff   : > { %896 = vmatprep.subr.bf16.mxu0 %v895_v51 }
 0x202   : > { %898 = vmatpush3.bf16.msra.mxu0 %v895_v51 }
 0x203   : > { %900 = vmatprep.subr.bf16.mxu0 %v899_v54 }
 0x206   : > { %902 = vmatpush3.bf16.msra.mxu0 %v899_v54 }
 0x207   : > { %904 = vmatprep.subr.bf16.mxu0 %v903_v57 }
 0x20a   : > { %906 = vmatpush3.bf16.msra.mxu0 %v903_v57 }
 0x20b   : > { %908 = vmatprep.subr.bf16.mxu0 %v907_v60 }
 0x20e   : > { %910 = vmatpush3.bf16.msra.mxu0 %v907_v60 }
 0x20f   : > { %912 = vmatprep.subr.bf16.mxu0 %v911_v63 }
 0x212   : > { %914 = vmatpush3.bf16.msra.mxu0 %v911_v63 }
 0x215   : > { %839 = vmatmul.mubr.f32.vlgmr.msra.gmra.mrb[0].mxu0 %v458_v0 }
 0x2e8   : > { %v840_v1 = vpop.f32.mrb[0].mxu0 }
 0x2e9   : > { %551 = vst [vmem:[#allocation4 + $0x8] sm:$0xff] %v840_v1  ;;  %v541_v2 = vpop.f32.mrb[1].mxu0 }
 0x2ea   : > { %550 = vst [vmem:[#allocation4] sm:$0xff] %v541_v2 }
 0x2eb PF: > { %p717_p12 = scmp.ne.s32.totalorder %s990_s22, 1 }
 0x2ec   : > { %v1007_v5 = vmov (!%p717_p12), 0.0|0.0   ;;  %vm1008_vm2 = vmmov (!%p717_p12), 0   ;;  %v1009_v7 = vmov (!%p717_p12), 0.0   ;;  %v555_v8 = vld [vmem:[%s1089_s9] sm:$0xff] (!%p717_p12)  ;;  %vm565_vm3 = vcmask (!%p717_p12), 130048  }
 0x2ed   : > { %554 = sbr.rel (%p717_p12) target bundleno = 974 (0x3ce), region = 60  ;;  %915 = vmatprep.subr.bf16.mxu0 (!%p717_p12), %v1007_v5  ;;  %845 = vmatprep.mubr.msk.f32.mxu0 (!%p717_p12), %vm1008_vm2, %v1009_v7  ;;  %v718_v9 = vld [vmem:[%s1235_s5] ss:$0 sm:$0xff] (!%p717_p12) }
 0x2f0   : > { %v557_v4 = vld [vmem:[#allocation4 + $0x8] sm:$0xff] (!%p717_p12) }
 0x2f1   : > { %v556_v3 = vld [vmem:[#allocation4] sm:$0xff] (!%p717_p12) }
 0x2f2   : > { %v916_v6 = vpack.c.bf16 (!%p717_p12), %v557_v4, %v556_v3 }
 0x2f4   : > { %917 = vmatpush3.bf16.msra.mxu0 %v916_v6 }
 0x2f7   : > { %846 = vmatmul.mubr.msk.f32.vlgmr.msra.gmra.mrb[0].mxu0 %vm565_vm3, %v555_v8 }
 0x3ca   : > { %v635_v10 = vpop.f32.mrb[0].mxu0 }
 0x3cb   : > { %v636_v11 = vadd.f32 %v718_v9, %v635_v10  ;;  %v847_v12 = vpop.f32.mrb[1].mxu0 }
 0x3cd   : > { %639 = vst [vmem:[%s1094_s12] sm:$0xff] %v636_v11 }
 0x3ce PF: > { %s16_s25 = sadd.s32 1, %s1002_s25   ;;  %s1237_s21 = smov %s994_s23 }
 0x3cf   : > { %p13_p13 = scmp.ge.s32.totalorder %s16_s25, 6   ;;  %s1238_s22 = smov %s998_s24 }
 0x3d0   : > { %s1239_s23 = smov %s1242_s26  ;;  %s1240_s24 = smov %s1246_s27 }
 0x3d1   :  { %15 = sbr.rel (!%p13_p13) target bundleno = 3 (0x3), region = 91 }

</bundles_post_ra>
